<compile_context>
chip_gen: v5e
topology: v5e:2x2
jax: 0.10.0
libtpu: 0.0.40
codegen_flags: <defaults>
</compile_context>

<pallas_src>
import functools
import math

import jax
import jax.numpy as jnp
from jax.experimental import pallas as pl
from jax.experimental.pallas import tpu as pltpu


def _round_up(n, k):
    return (n + k - 1) // k * k


def _ensemble_kernel(x_ref, w_ref, b_ref, o_ref, *, n_models):
    """Grid = (batch_tile i, model m).  Model axis (last) is the reduction."""
    m = pl.program_id(1)

    @pl.when(m == 0)
    def _():
        o_ref[...] = jnp.zeros_like(o_ref)

    # logits = x @ W_m + b_m     (bf16 operands, f32 MXU accumulation)
    logits = jnp.dot(x_ref[...], w_ref[...],
                     preferred_element_type=jnp.float32) + b_ref[m]

    # numerically-stable softmax over the class (lane) axis
    mx = jnp.max(logits, axis=-1, keepdims=True)
    e = jnp.exp(logits - mx)
    p = e * pl.reciprocal(jnp.sum(e, axis=-1, keepdims=True), approx=True)

    # accumulate directly into the resident output block
    o_ref[...] += p

    @pl.when(m == n_models - 1)
    def _():
        acc = o_ref[...]
        # log(clamp(acc / M, 1e-40)) == log(max(acc, M*1e-40)) - log(M)
        acc = jnp.maximum(acc, jnp.float32(n_models * 1e-40))
        o_ref[...] = jnp.log(acc) - jnp.float32(math.log(n_models))


@functools.partial(jax.jit, static_argnames=("tm",))
def ensemble_forward(x, weights, biases, *, tm=128):
    """x: (B, H) f32; weights: (M, H, C) f32; biases: (M, 1, C) f32 -> (B, C) f32."""
    B, H = x.shape
    M, _, C = weights.shape

    if M == 1:
        # Single-model branch: raw model output; leave to XLA (perf review).
        return (x @ weights[0] + biases[0]).astype(jnp.float32)

    # ---- padding for lane-dense / aligned tiles -------------------------
    H_pad = _round_up(H, 8)              # sublane alignment for the W block
    C_pad = _round_up(C, 128)            # lane-dense output (unmasked vst)
    tm = min(tm, _round_up(B, 8))        # batch tile
    B_pad = _round_up(B, tm)

    # Stream x / W as bf16 (memory-bound regime); softmax math stays f32.
    x_p = jnp.zeros((B_pad, H_pad), jnp.bfloat16).at[:B, :H].set(
        x.astype(jnp.bfloat16))
    w_p = jnp.zeros((M, H_pad, C_pad), jnp.bfloat16).at[:, :H, :C].set(
        weights.astype(jnp.bfloat16))
    # Padded class columns get a huge negative bias so softmax ignores them.
    b_p = jnp.full((M, 1, C_pad), -1e30, jnp.float32).at[:, :, :C].set(
        biases.astype(jnp.float32))

    kernel = functools.partial(_ensemble_kernel, n_models=M)

    out_p = pl.pallas_call(
        kernel,
        out_shape=jax.ShapeDtypeStruct((B_pad, C_pad), jnp.float32),
        grid_spec=pltpu.PrefetchScalarGridSpec(
            num_scalar_prefetch=0,
            grid=(B_pad // tm, M),
            in_specs=[
                # x tile: resident across the model axis
                pl.BlockSpec((tm, H_pad), lambda i, m: (i, 0)),
                # W[m]: streamed per model (double-buffered by the pipeline)
                pl.BlockSpec((None, H_pad, C_pad), lambda i, m: (m, 0, 0)),
                # biases: fully resident, indexed with program_id inside
                pl.BlockSpec((M, 1, C_pad), lambda i, m: (0, 0, 0)),
            ],
            # constant over m -> resident accumulator, no scratch needed
            out_specs=pl.BlockSpec((tm, C_pad), lambda i, m: (i, 0)),
        ),
        compiler_params=pltpu.CompilerParams(
            dimension_semantics=("parallel", "arbitrary")),
    )(x_p, w_p, b_p)

    return out_p[:B, :C]


def _reference(x, weights, biases):
    """Pure-JAX (f32) reference mirroring the PyTorch forward."""
    M = weights.shape[0]
    if M > 1:
        logits = jnp.einsum("bh,mhc->mbc", x, weights) + biases  # (M, B, C)
        probs = jax.nn.softmax(logits, axis=-1)
        avg = jnp.sum(probs, axis=0) / M
        return jnp.log(jnp.maximum(avg, 1e-40))
    return x @ weights[0] + biases[0]


if __name__ == "__main__":
    key = jax.random.PRNGKey(0)
    k_x, k_w, k_b = jax.random.split(key, 3)

    B, H, C, M = 8, 32, 16, 3  # batch, hidden, classes, ensemble members

    x = jax.random.normal(k_x, (B, H), dtype=jnp.float32)
    weights = jax.random.normal(k_w, (M, H, C), dtype=jnp.float32) * 0.1
    biases = jax.random.normal(k_b, (M, 1, C), dtype=jnp.float32) * 0.01

    out = jax.block_until_ready(ensemble_forward(x, weights, biases))
    ref = _reference(x, weights, biases)
    assert out.shape == (B, C)
    # bf16 weight streaming + approx reciprocal -> compare at bf16 precision
    assert jnp.allclose(out, ref, atol=2e-2, rtol=2e-2), "mismatch vs reference"

    # Single-model branch (returns raw model output).
    out1 = jax.block_until_ready(ensemble_forward(x, weights[:1], biases[:1]))
    ref1 = _reference(x, weights[:1], biases[:1])
    assert out1.shape == (B, C)
    assert jnp.allclose(out1, ref1, atol=1e-3, rtol=1e-3), "single-model mismatch"

    print("KERNEL_OK")
</pallas_src>

<mosaic_0001>
module attributes {stable_mosaic.version = 11 : i64} {
  func.func @_ensemble_kernel(%arg0: i32, %arg1: i32, %arg2: memref<8x32xbf16, #tpu.memory_space<vmem>>, %arg3: memref<1x32x128xbf16, #tpu.memory_space<vmem>>, %arg4: memref<3x1x128xf32, #tpu.memory_space<vmem>>, %arg5: memref<8x128xf32, #tpu.memory_space<vmem>>) attributes {dimension_semantics = [#tpu.dimension_semantics<parallel>, #tpu.dimension_semantics<arbitrary>], iteration_bounds = array<i64: 1, 3>, scalar_prefetch = 0 : i64, scratch_operands = 0 : i64, tpu.core_type = #tpu.core_type<tc>, window_params = [{transform_indices = @transform_0, window_bounds = array<i64: 8, 32>}, {transform_indices = @transform_1, window_bounds = array<i64: 1, 32, 128>}, {pipeline_mode = #tpu.pipeline_mode<synchronous>, transform_indices = @transform_2, window_bounds = array<i64: 3, 1, 128>}, {transform_indices = @transform_3, window_bounds = array<i64: 8, 128>}]} {
    %c0_i32 = arith.constant 0 : i32
    %0 = arith.cmpi eq, %arg1, %c0_i32 : i32
    %1 = arith.extui %0 : i1 to i32
    %c0_i32_0 = arith.constant 0 : i32
    %2 = arith.cmpi ne, %1, %c0_i32_0 : i32
    scf.if %2 {
      %cst_14 = arith.constant 0.000000e+00 : f32
      %28 = vector.broadcast %cst_14 : f32 to vector<8x128xf32>
      %c0_15 = arith.constant 0 : index
      %c0_16 = arith.constant 0 : index
      %29 = vector.load %arg5[%c0_15, %c0_16] : memref<8x128xf32, #tpu.memory_space<vmem>>, vector<8x128xf32>
      tpu.vector_store %arg5[%c0_15, %c0_16], %28 {strides = array<i32>} : memref<8x128xf32, #tpu.memory_space<vmem>>, vector<8x128xf32>,
    } else {
    }
    %c0 = arith.constant 0 : index
    %c0_1 = arith.constant 0 : index
    %3 = vector.load %arg2[%c0, %c0_1] : memref<8x32xbf16, #tpu.memory_space<vmem>>, vector<8x32xbf16>
    %c0_2 = arith.constant 0 : index
    %c0_3 = arith.constant 0 : index
    %c0_4 = arith.constant 0 : index
    %4 = vector.load %arg3[%c0_2, %c0_3, %c0_4] : memref<1x32x128xbf16, #tpu.memory_space<vmem>>, vector<1x32x128xbf16>
    %5 = vector.shape_cast %4 : vector<1x32x128xbf16> to vector<32x128xbf16>
    %cst = arith.constant dense<0.000000e+00> : vector<8x128xf32>
    %6 = tpu.matmul %3, %5, %cst {dimension_numbers = #tpu.dot_dimension_numbers<[1], [0], [0], [1], [0, 0, 1, 1], [], []>} : vector<8x32xbf16>, vector<32x128xbf16>, vector<8x128xf32> -> vector<8x128xf32>
    %7 = arith.index_cast %arg1 : i32 to index
    %c0_5 = arith.constant 0 : index
    %c0_6 = arith.constant 0 : index
    %8 = vector.load %arg4[%7, %c0_5, %c0_6] : memref<3x1x128xf32, #tpu.memory_space<vmem>>, vector<1x1x128xf32>
    %9 = vector.shape_cast %8 : vector<1x1x128xf32> to vector<1x128xf32>
    %10 = vector.broadcast %9 : vector<1x128xf32> to vector<8x128xf32>
    %11 = arith.addf %6, %10 : vector<8x128xf32>
    %cst_7 = arith.constant dense<0xFF800000> : vector<8xf32>
    %12 = vector.multi_reduction <maximumf>, %11, %cst_7 [1] : vector<8x128xf32> to vector<8xf32>
    %13 = vector.shape_cast %12 : vector<8xf32> to vector<8x1xf32>
    %14 = vector.broadcast %13 : vector<8x1xf32> to vector<8x128xf32>
    %15 = arith.subf %11, %14 : vector<8x128xf32>
    %16 = math.exp %15 : vector<8x128xf32>
    %cst_8 = arith.constant dense<0.000000e+00> : vector<8xf32>
    %17 = vector.multi_reduction <add>, %16, %cst_8 [1] : vector<8x128xf32> to vector<8xf32>
    %18 = vector.shape_cast %17 : vector<8xf32> to vector<8x1xf32>
    %19 = tpu.reciprocal %18 {approx = true} : vector<8x1xf32> -> vector<8x1xf32>
    %20 = vector.broadcast %19 : vector<8x1xf32> to vector<8x128xf32>
    %21 = arith.mulf %16, %20 : vector<8x128xf32>
    %c0_9 = arith.constant 0 : index
    %c0_10 = arith.constant 0 : index
    %22 = vector.load %arg5[%c0_9, %c0_10] : memref<8x128xf32, #tpu.memory_space<vmem>>, vector<8x128xf32>
    %23 = arith.addf %22, %21 : vector<8x128xf32>
    %c0_11 = arith.constant 0 : index
    %c0_12 = arith.constant 0 : index
    %24 = vector.load %arg5[%c0_11, %c0_12] : memref<8x128xf32, #tpu.memory_space<vmem>>, vector<8x128xf32>
    tpu.vector_store %arg5[%c0_11, %c0_12], %23 {strides = array<i32>} : memref<8x128xf32, #tpu.memory_space<vmem>>, vector<8x128xf32>,
    %c2_i32 = arith.constant 2 : i32
    %25 = arith.cmpi eq, %arg1, %c2_i32 : i32
    %26 = arith.extui %25 : i1 to i32
    %c0_i32_13 = arith.constant 0 : i32
    %27 = arith.cmpi ne, %26, %c0_i32_13 : i32
    scf.if %27 {
      %c0_14 = arith.constant 0 : index
      %c0_15 = arith.constant 0 : index
      %28 = vector.load %arg5[%c0_14, %c0_15] : memref<8x128xf32, #tpu.memory_space<vmem>>, vector<8x128xf32>
      %cst_16 = arith.constant 3.000000e-40 : f32
      %29 = vector.broadcast %cst_16 : f32 to vector<8x128xf32>
      %30 = arith.maximumf %28, %29 : vector<8x128xf32>
      %31 = math.log %30 : vector<8x128xf32>
      %cst_17 = arith.constant 1.09861231 : f32
      %32 = vector.broadcast %cst_17 : f32 to vector<8x128xf32>
      %33 = arith.subf %31, %32 : vector<8x128xf32>
      %c0_18 = arith.constant 0 : index
      %c0_19 = arith.constant 0 : index
      %34 = vector.load %arg5[%c0_18, %c0_19] : memref<8x128xf32, #tpu.memory_space<vmem>>, vector<8x128xf32>
      tpu.vector_store %arg5[%c0_18, %c0_19], %33 {strides = array<i32>} : memref<8x128xf32, #tpu.memory_space<vmem>>, vector<8x128xf32>,
    } else {
    }
    return
  }
  func.func @transform_0(%arg0: i32, %arg1: i32) -> (i32, i32) {
    %c0_i32 = arith.constant 0 : i32
    %c0_i32_0 = arith.constant 0 : i32
    return %arg0, %c0_i32 : i32, i32
  }
  func.func @transform_1(%arg0: i32, %arg1: i32) -> (i32, i32, i32) {
    %c0_i32 = arith.constant 0 : i32
    %c0_i32_0 = arith.constant 0 : i32
    %c0_i32_1 = arith.constant 0 : i32
    return %arg1, %c0_i32, %c0_i32_0 : i32, i32, i32
  }
  func.func @transform_2(%arg0: i32, %arg1: i32) -> (i32, i32, i32) {
    %c0_i32 = arith.constant 0 : i32
    %c0_i32_0 = arith.constant 0 : i32
    %c0_i32_1 = arith.constant 0 : i32
    %c0_i32_2 = arith.constant 0 : i32
    return %c0_i32, %c0_i32_0, %c0_i32_1 : i32, i32, i32
  }
  func.func @transform_3(%arg0: i32, %arg1: i32) -> (i32, i32) {
    %c0_i32 = arith.constant 0 : i32
    %c0_i32_0 = arith.constant 0 : i32
    return %arg0, %c0_i32 : i32, i32
  }
}

</mosaic_0001>

<bundles_post_ra>
// kernel: ensemble_forward.1
= control target key start
LH: loop header
LB: loop body
LE: loop exit
PB: predicated region body
PF: predicated region fallthrough
CT: control target
= control target key end

     0   :  { %8 = vsyncpa [#allocation3], 0  ;;  %s478_s12 = smov 0   ;;  %s480_s13 = smov 0   ;;  %s527_s0 = inlined_call_operand.vmem [shape: bf16[8,32], index: 0, kind: input, shape index: {}]   ;;  %s528_s1 = inlined_call_operand.vmem [shape: bf16[3,32,128], index: 1, kind: input, shape index: {}]   ;;  %s529_s2 = inlined_call_operand.vmem [shape: f32[3,1,128], index: 2, kind: input, shape index: {}]   ;;  %s530_s3 = inlined_call_operand.hbm [shape: f32[8,128], index: 3, kind: output, shape index: {}]  }
   0x1   :  { %s482_s14 = smov 0  }
   0x2 LB: > { %s335_s15 = sadd.s32 4294967295, %s454_s14   ;;  %s23_s16 = sadd.s32 1, %s450_s13  ;;  %s454_s14 = sphi %s482_s14, %s14_s14   ;;  %s450_s13 = sphi %s480_s13, %s532_s13   ;;  %s446_s12 = sphi %s478_s12, %s531_s12  }
   0x3   : > { %p24_p0 = scmp.ge.s32.totalorder %s23_s16, 3  ;;  %p339_p1 = scmp.ge.s32.totalorder %s454_s14, 1 }
   0x4   : > { %p159_p2 = scmp.lt.s32.totalorder %s454_s14, 4 }
   0x5   : > { %s534_s16 = smov (%p24_p0, %s23_s16), 0 }
   0x6   : > { %p160_p3 = pnand %p339_p1, %p159_p2 }
   0x7   : > { %p186_p4 = scmp.lt.s32.totalorder (!%p160_p3), %s446_s12, 2  ;;  %p342_p5 = scmp.ne.s32.totalorder (!%p160_p3), %s446_s12, 0 }
   0x8   : > { %163 = sbr.rel (%p160_p3) target bundleno = 439 (0x1b7), region = 32 }
   0xd   : > { %s187_s17 = scalar_select %p186_p4, %s446_s12, 2 }
   0xe   : > { %195 = sbr.rel (%p342_p5) target bundleno = 21 (0x15), region = 36 }
   0xf   : > { %s358_s18 = sshll.u32 %s187_s17, 4 }
  0x10   : > { %s190_s21 = scalar_lea.vmem %s528_s1, %s358_s18 }
  0x13   : > { %v456_v0 = vmov 0.0  }
  0x14   : > { %196 = vst [vmem:[#allocation2] sm:$0xff] %v456_v0 }
  0x15 PF: > { %v360_v1 = vld [vmem:[%s190_s21 + $0x8] sm:$0xff]  ;;  %s202_s24 = scalar_lea.vmem %s529_s2, %s446_s12  ;;  %v359_v2 = vld [vmem:[%s190_s21] sm:$0xff]  ;;  %vm219_vm0 = vcmask 261120   ;;  %p352_p6 = scmp.ne.s32.totalorder %s446_s12, 2 }
  0x16   : > { %229 = vmatpush.bf16.msra.mxu0 %v360_v1  ;;  %v197_v3 = vld [vmem:[%s527_s0] sm:$0xf] }
  0x17   : > { %v393_v4 = vld [vmem:[%s202_s24] ss:$0 sm:$0xff] }
  0x1a   : > { %230 = vmatpush.bf16.msra.mxu0 %v359_v2 }
  0x1b   : > { %v245_v14 = vld [vmem:[#allocation2] sm:$0xff] }
  0x1d   : > { %351 = vmatmul.msk.bf16.vlgmr.msra.gmra.mxu0 %vm219_vm0, %v197_v3 }
  0x9a   : > { %v232_v5 = vpop.f32.mrf.mxu0 }
  0x9b   : > { %v233_v6 = vadd.f32 %v393_v4, %v232_v5 }
  0x9d   : > { %236 = vmax.xlane.f32.xlu0 %v233_v6 }
  0xa2   : > { %v234_v7 = vpop.f32.mrf.mxu0 }
 0x110   : > { %v237_v8 = vpop.xlane.xlu0 %236 }
 0x111   : > { %v238_v9 = vsub.f32 %v233_v6, %v237_v8 }
 0x113   : > { %v239_v10 = vmul.f32 1.442695, %v238_v9 }
 0x115   : > { %394 = vpow2.f32 %v239_v10 }
 0x11b   : > { %v395_v11 = vpop.eup %394 }
 0x11c   : > { %241 = vadd.xlane.f32.xlu0 %v395_v11 }
 0x18f   : > { %v242_v12 = vpop.xlane.xlu0 %241 }
 0x190   : > { %396 = vrcp.f32 %v242_v12 }
 0x196   : > { %v397_v13 = vpop.eup %396 }
 0x197   : > { %v244_v15 = vmul.f32 %v397_v13, %v395_v11  ;;  %251 = sbr.rel (%p352_p6) target bundleno = 433 (0x1b1), region = 40 }
 0x199   : > { %v246_v16 = vadd.f32 %v245_v14, %v244_v15 }
 0x19b   : > { %247 = vst [vmem:[#allocation2] sm:$0xff] %v246_v16 }
 0x1a2   : > { %v252_v17 = vld [vmem:[#allocation2] sm:$0xff] }
 0x1a3   : > { %v253_v18 = vmax.f32 %v252_v17, 3e-40 }
 0x1a5   : > { %398 = vlog2.f32 %v253_v18 }
 0x1ab   : > { %v399_v19 = vpop.eup %398 }
 0x1ac   : > { %v255_v20 = vmul.f32 0.6931472, %v399_v19 }
 0x1ae   : > { %v353_v21 = vadd.f32 -1.0986123, %v255_v20 }
 0x1b0   : > { %257 = vst [vmem:[#allocation2] sm:$0xff] %v353_v21 }
 0x1b1 PF: > { %p365_p7 = scmp.eq.s32.totalorder %s335_s15, 2  ;;  %s268_s29 = sshll.u32 %s530_s3, 4  ;;  %s269_s29 = int_to_ptr.hbm [resolvable:$true] %s268_s29 }
 0x1b2   : > { %s457_s30 = smov [#allocation2]  }
 0x1b3   : > { %s266_s4 = sshll.u32 %s457_s30, 4  ;;  %s267_s4 = int_to_ptr.vmem [resolvable:$true] %s266_s4 }
 0x1b4   : > { %362 = dma.vmem_to_hbm [thread:$0]  (%p365_p7), %s267_s4, 128, %s269_s29, [#allocation3]  }
 0x1b5   : > { %441 = dma.done.wait (%p365_p7), [#allocation3], 128  }
 0x1b6   : > { %443 = vsyncadd (%p365_p7), [#allocation3], 4294967168 }
 0x1b7 PF: > { %s14_s14 = sadd.s32 1, %s454_s14   ;;  %s531_s12 = smov %s450_s13 }
 0x1b8   : > { %p11_p8 = scmp.ge.s32.totalorder %s14_s14, 5   ;;  %s532_s13 = smov %s534_s16 }
 0x1ba   :  { %13 = sbr.rel (!%p11_p8) target bundleno = 2 (0x2), region = 72 }
 0x1bf   :  { %282 = vsyncpa [#allocation3], 1 }
 0x1c0   :  { %284 = vsyncpa [#allocation3 + $0x1], 1 }

</bundles_post_ra>
